<compile_context>
chip_gen: v6e
topology: v6e:2x2x1
jax: 0.10.0
libtpu: 0.0.40
codegen_flags: <defaults>
</compile_context>

<pallas_src>
import numpy as np
import jax
import jax.numpy as jnp
from jax.experimental import pallas as pl
from jax.experimental.pallas import tpu as pltpu


def _round_up(x, m):
    return ((x + m - 1) // m) * m


def _layout(S, A, H):
    """Row layout of the packed weight/bias slab (lane width = H)."""
    Ap = _round_up(A, 8)                 # actions padded to a sublane multiple
    off = {
        "ws": 0,                         # (S,  H)  [Ws | 0]
        "wa": S,                         # (Ap, H)  [0  | Wa]
        "w2": S + Ap,                    # (H,  H)
        "w3": S + Ap + H,                # row: w3[:, 0]
        "b1": S + Ap + H + 8,            # row: [bs | ba]
        "b2": S + Ap + H + 16,           # row: b2
        "b3": S + Ap + H + 24,           # row: b3 at lane 0
        "total": S + Ap + H + 32,
    }
    return Ap, off


def _elu(x):
    # ELU(alpha=1): the discarded exp branch can only be +inf (never NaN),
    # so no clamp is needed in the forward pass.
    return jnp.where(x > 0.0, x, jnp.exp(x) - 1.0)


def _make_kernel(B, S, Ap, H, off):
    r_wa, r_w2, r_w3 = off["wa"], off["w2"], off["w3"]
    r_b1, r_b2, r_b3 = off["b1"], off["b2"], off["b3"]
    inv_n = 1.0 / float(B)

    def kernel(states_ref, actions_ref, bnp_ref, wp_ref, out_ref):
        s = states_ref[...]                       # (B, S) f32
        a = actions_ref[...]                      # (B, Ap) f32 (zero-padded cols)

        # ---- BatchNorm1d (training mode): one-pass batch statistics ----
        mean = jnp.sum(s, axis=0, keepdims=True) * inv_n
        ex2 = jnp.sum(s * s, axis=0, keepdims=True) * inv_n
        var = ex2 - mean * mean                   # biased variance
        scale = jax.lax.rsqrt(var + 1e-5) * bnp_ref[0:1, :]
        s_bn = (s - mean) * scale + bnp_ref[1:2, :]

        # ---- fc_state + fc_actions; concat folded into lane-padded weights ----
        #   [Ws|0] and [0|Wa] write x1 into lanes 0:H/2 and x2 into lanes H/2:H
        #   of one (B, H) pre-activation; bias row b1 = [bs | ba].
        x = _elu(
            jnp.dot(s_bn, wp_ref[0:S, :], preferred_element_type=jnp.float32)
            + jnp.dot(a, wp_ref[r_wa:r_w2, :], preferred_element_type=jnp.float32)
            + wp_ref[r_b1:r_b1 + 1, :]
        )

        # ---- fc2: single unsplit (B,H) @ (H,H) matmul ----
        h = _elu(
            jnp.dot(x, wp_ref[r_w2:r_w3, :], preferred_element_type=jnp.float32)
            + wp_ref[r_b2:r_b2 + 1, :]
        )

        # ---- fc3 (H -> 1): VPU multiply + cross-lane reduce, no MXU dot ----
        w3_row = wp_ref[r_w3:r_w3 + 1, :]          # (1, H)
        b3 = wp_ref[r_b3:r_b3 + 1, 0:1]            # (1, 1)
        out = jnp.sum(h * w3_row, axis=-1, keepdims=True) + b3
        out_ref[...] = out.astype(out_ref.dtype)

    return kernel


def critic_forward(states, actions, bn_pack, w_pack):
    """states: (B, S) f32, actions: (B, A) f32, bn_pack: (2, S), w_pack: (R, H)."""
    B, S = states.shape
    A = actions.shape[1]
    H = w_pack.shape[1]
    Ap, off = _layout(S, A, H)
    assert bn_pack.shape == (2, S)
    assert w_pack.shape[0] == off["total"], "w_pack layout mismatch"

    actions_p = actions if Ap == A else jnp.pad(actions, ((0, 0), (0, Ap - A)))

    kernel = _make_kernel(B, S, Ap, H, off)
    return pl.pallas_call(
        kernel,
        out_shape=jax.ShapeDtypeStruct((B, 1), jnp.float32),
        in_specs=[pl.BlockSpec(memory_space=pltpu.MemorySpace.VMEM)
                  for _ in range(4)],
        out_specs=pl.BlockSpec(memory_space=pltpu.MemorySpace.VMEM),
    )(states, actions_p, bn_pack, w_pack)


def init_params(key, global_input, joint_action_dim, hidden):
    """Deterministic synthetic init mirroring PyTorch default Linear init
    (uniform +-1/sqrt(fan_in)); BatchNorm affine = (weight=1, bias=0).
    Weights stored as (in_features, out_features) so y = x @ W + b."""
    h2 = hidden // 2

    def linear(key, fan_in, fan_out):
        k1, k2 = jax.random.split(key)
        bound = 1.0 / np.sqrt(fan_in)
        w = jax.random.uniform(k1, (fan_in, fan_out), jnp.float32, -bound, bound)
        b = jax.random.uniform(k2, (1, fan_out), jnp.float32, -bound, bound)
        return w, b

    k_s, k_a, k_2, k_3 = jax.random.split(key, 4)
    ws, bs = linear(k_s, global_input, h2)
    wa, ba = linear(k_a, joint_action_dim, h2)
    w2, b2 = linear(k_2, hidden, hidden)
    w3, b3 = linear(k_3, hidden, 1)
    return {
        "bn_w": jnp.ones((1, global_input), jnp.float32),
        "bn_b": jnp.zeros((1, global_input), jnp.float32),
        "ws": ws, "bs": bs,
        "wa": wa, "ba": ba,
        "w2": w2, "b2": b2,
        "w3": w3, "b3": b3,
    }


def pack_params(p):
    """Pack the 11 parameter tensors into two contiguous f32 operands:
         bn_pack: (2, S)      rows = [bn_weight, bn_bias]
         w_pack : (R, H)      [Ws|0] ; [0|Wa] ; W2 ; w3 row ; [bs|ba] ; b2 ; b3
       Done once on the host; the kernel slices it with static offsets."""
    S, h2 = p["ws"].shape
    A = p["wa"].shape[0]
    H = p["w2"].shape[0]
    Ap, off = _layout(S, A, H)

    wsp = jnp.pad(p["ws"], ((0, 0), (0, H - h2)))                 # [Ws | 0]
    wap = jnp.pad(p["wa"], ((0, Ap - A), (h2, H - 2 * h2)))       # [0  | Wa]
    b1 = jnp.concatenate([p["bs"], p["ba"]], axis=1)              # (1, H)
    w3r = p["w3"].T                                               # (1, H)
    b3r = jnp.pad(p["b3"], ((0, 0), (0, H - 1)))                  # (1, H)

    pad8 = lambda r: jnp.pad(r, ((0, 8 - r.shape[0]), (0, 0)))    # 8-row align
    w_pack = jnp.concatenate(
        [wsp, wap, p["w2"], pad8(w3r), pad8(b1), pad8(p["b2"]), pad8(b3r)],
        axis=0).astype(jnp.float32)
    assert w_pack.shape == (off["total"], H)

    bn_pack = jnp.concatenate([p["bn_w"], p["bn_b"]], axis=0).astype(jnp.float32)
    return bn_pack, w_pack


def reference_forward(states, actions, params):
    """Plain-JAX reference of the same math (for a quick self-check)."""
    s = states
    mean = jnp.mean(s, axis=0, keepdims=True)
    var = jnp.mean((s - mean) ** 2, axis=0, keepdims=True)
    s_bn = (s - mean) / jnp.sqrt(var + 1e-5) * params["bn_w"] + params["bn_b"]
    elu = lambda x: jnp.where(x > 0, x, jnp.exp(jnp.minimum(x, 0.0)) - 1.0)
    x1 = elu(s_bn @ params["ws"] + params["bs"])
    x2 = elu(actions @ params["wa"] + params["ba"])
    x = jnp.concatenate([x1, x2], axis=-1)
    h = elu(x @ params["w2"] + params["b2"])
    return h @ params["w3"] + params["b3"]


if __name__ == "__main__":
    # Small shapes consistent with the module:
    #   nr_actions=4, nr_agents=3, state_shape=(4, 8, 8), nr_hidden_layers=32
    nr_actions, nr_agents = 4, 3
    state_shape = (4, 8, 8)
    hidden = 32
    batch = 8

    global_input = int(np.prod(state_shape))           # 256
    joint_action_dim = nr_actions * nr_agents           # 12

    key = jax.random.PRNGKey(0)
    k_p, k_s, k_a = jax.random.split(key, 3)

    params = init_params(k_p, global_input, joint_action_dim, hidden)
    bn_pack, w_pack = pack_params(params)               # packed once, reused per call

    # raw inputs as the PyTorch module would see them (then flattened in build_inputs)
    states_raw = jax.random.normal(k_s, (batch,) + state_shape, jnp.float32)
    actions_raw = jax.random.uniform(k_a, (batch, nr_agents, nr_actions), jnp.float32)

    states = states_raw.reshape(batch, -1)               # build_inputs: view(batch, -1)
    actions = actions_raw.reshape(batch, -1)

    out = critic_forward(states, actions, bn_pack, w_pack)
    out = jax.block_until_ready(out)

    ref = reference_forward(states, actions, params)
    assert out.shape == (batch, 1)
    np.testing.assert_allclose(np.asarray(out), np.asarray(ref), rtol=1e-4, atol=1e-4)

    print("KERNEL_OK")
</pallas_src>

<mosaic_0001>
module attributes {stable_mosaic.version = 11 : i64} {
  func.func @kernel(%arg0: memref<8x256xf32, #tpu.memory_space<vmem>>, %arg1: memref<8x16xf32, #tpu.memory_space<vmem>>, %arg2: memref<2x256xf32, #tpu.memory_space<vmem>>, %arg3: memref<336x32xf32, #tpu.memory_space<vmem>>, %arg4: memref<8x1xf32, #tpu.memory_space<vmem>>) attributes {dimension_semantics = [], scalar_prefetch = 0 : i64, scratch_operands = 0 : i64, tpu.core_type = #tpu.core_type<tc>} {
    %c0 = arith.constant 0 : index
    %c0_0 = arith.constant 0 : index
    %0 = vector.load %arg0[%c0, %c0_0] : memref<8x256xf32, #tpu.memory_space<vmem>>, vector<8x256xf32>
    %c0_1 = arith.constant 0 : index
    %c0_2 = arith.constant 0 : index
    %1 = vector.load %arg1[%c0_1, %c0_2] : memref<8x16xf32, #tpu.memory_space<vmem>>, vector<8x16xf32>
    %cst = arith.constant dense<0.000000e+00> : vector<256xf32>
    %2 = vector.multi_reduction <add>, %0, %cst [0] : vector<8x256xf32> to vector<256xf32>
    %3 = vector.shape_cast %2 : vector<256xf32> to vector<1x256xf32>
    %cst_3 = arith.constant 1.250000e-01 : f32
    %4 = vector.broadcast %cst_3 : f32 to vector<1x256xf32>
    %5 = arith.mulf %3, %4 : vector<1x256xf32>
    %6 = arith.mulf %0, %0 : vector<8x256xf32>
    %cst_4 = arith.constant dense<0.000000e+00> : vector<256xf32>
    %7 = vector.multi_reduction <add>, %6, %cst_4 [0] : vector<8x256xf32> to vector<256xf32>
    %8 = vector.shape_cast %7 : vector<256xf32> to vector<1x256xf32>
    %cst_5 = arith.constant 1.250000e-01 : f32
    %9 = vector.broadcast %cst_5 : f32 to vector<1x256xf32>
    %10 = arith.mulf %8, %9 : vector<1x256xf32>
    %11 = arith.mulf %5, %5 : vector<1x256xf32>
    %12 = arith.subf %10, %11 : vector<1x256xf32>
    %cst_6 = arith.constant 9.99999974E-6 : f32
    %13 = vector.broadcast %cst_6 : f32 to vector<1x256xf32>
    %14 = arith.addf %12, %13 : vector<1x256xf32>
    %15 = math.rsqrt %14 : vector<1x256xf32>
    %c0_7 = arith.constant 0 : index
    %c0_8 = arith.constant 0 : index
    %16 = vector.load %arg2[%c0_7, %c0_8] : memref<2x256xf32, #tpu.memory_space<vmem>>, vector<1x256xf32>
    %17 = arith.mulf %15, %16 : vector<1x256xf32>
    %18 = vector.broadcast %5 : vector<1x256xf32> to vector<8x256xf32>
    %19 = arith.subf %0, %18 : vector<8x256xf32>
    %20 = vector.broadcast %17 : vector<1x256xf32> to vector<8x256xf32>
    %21 = arith.mulf %19, %20 : vector<8x256xf32>
    %c1 = arith.constant 1 : index
    %c0_9 = arith.constant 0 : index
    %22 = vector.load %arg2[%c1, %c0_9] : memref<2x256xf32, #tpu.memory_space<vmem>>, vector<1x256xf32>
    %23 = vector.broadcast %22 : vector<1x256xf32> to vector<8x256xf32>
    %24 = arith.addf %21, %23 : vector<8x256xf32>
    %c0_10 = arith.constant 0 : index
    %c0_11 = arith.constant 0 : index
    %25 = vector.load %arg3[%c0_10, %c0_11] : memref<336x32xf32, #tpu.memory_space<vmem>>, vector<256x32xf32>
    %cst_12 = arith.constant dense<0.000000e+00> : vector<8x32xf32>
    %26 = tpu.matmul %24, %25, %cst_12 {dimension_numbers = #tpu.dot_dimension_numbers<[1], [0], [0], [1], [0, 0, 1, 1], [], []>} : vector<8x256xf32>, vector<256x32xf32>, vector<8x32xf32> -> vector<8x32xf32>
    %c256 = arith.constant 256 : index
    %c0_13 = arith.constant 0 : index
    %27 = vector.load %arg3[%c256, %c0_13] : memref<336x32xf32, #tpu.memory_space<vmem>>, vector<16x32xf32>
    %cst_14 = arith.constant dense<0.000000e+00> : vector<8x32xf32>
    %28 = tpu.matmul %1, %27, %cst_14 {dimension_numbers = #tpu.dot_dimension_numbers<[1], [0], [0], [1], [0, 0, 1, 1], [], []>} : vector<8x16xf32>, vector<16x32xf32>, vector<8x32xf32> -> vector<8x32xf32>
    %29 = arith.addf %26, %28 : vector<8x32xf32>
    %c312 = arith.constant 312 : index
    %c0_15 = arith.constant 0 : index
    %30 = vector.load %arg3[%c312, %c0_15] : memref<336x32xf32, #tpu.memory_space<vmem>>, vector<1x32xf32>
    %31 = vector.broadcast %30 : vector<1x32xf32> to vector<8x32xf32>
    %32 = arith.addf %29, %31 : vector<8x32xf32>
    %cst_16 = arith.constant 0.000000e+00 : f32
    %33 = vector.broadcast %cst_16 : f32 to vector<8x32xf32>
    %34 = arith.cmpf ogt, %32, %33 : vector<8x32xf32>
    %35 = math.exp %32 : vector<8x32xf32>
    %cst_17 = arith.constant 1.000000e+00 : f32
    %36 = vector.broadcast %cst_17 : f32 to vector<8x32xf32>
    %37 = arith.subf %35, %36 : vector<8x32xf32>
    %38 = arith.select %34, %32, %37 : vector<8x32xi1>, vector<8x32xf32>
    %c272 = arith.constant 272 : index
    %c0_18 = arith.constant 0 : index
    %39 = vector.load %arg3[%c272, %c0_18] : memref<336x32xf32, #tpu.memory_space<vmem>>, vector<32x32xf32>
    %cst_19 = arith.constant dense<0.000000e+00> : vector<8x32xf32>
    %40 = tpu.matmul %38, %39, %cst_19 {dimension_numbers = #tpu.dot_dimension_numbers<[1], [0], [0], [1], [0, 0, 1, 1], [], []>} : vector<8x32xf32>, vector<32x32xf32>, vector<8x32xf32> -> vector<8x32xf32>
    %c320 = arith.constant 320 : index
    %c0_20 = arith.constant 0 : index
    %41 = vector.load %arg3[%c320, %c0_20] : memref<336x32xf32, #tpu.memory_space<vmem>>, vector<1x32xf32>
    %42 = vector.broadcast %41 : vector<1x32xf32> to vector<8x32xf32>
    %43 = arith.addf %40, %42 : vector<8x32xf32>
    %cst_21 = arith.constant 0.000000e+00 : f32
    %44 = vector.broadcast %cst_21 : f32 to vector<8x32xf32>
    %45 = arith.cmpf ogt, %43, %44 : vector<8x32xf32>
    %46 = math.exp %43 : vector<8x32xf32>
    %cst_22 = arith.constant 1.000000e+00 : f32
    %47 = vector.broadcast %cst_22 : f32 to vector<8x32xf32>
    %48 = arith.subf %46, %47 : vector<8x32xf32>
    %49 = arith.select %45, %43, %48 : vector<8x32xi1>, vector<8x32xf32>
    %c304 = arith.constant 304 : index
    %c0_23 = arith.constant 0 : index
    %50 = vector.load %arg3[%c304, %c0_23] : memref<336x32xf32, #tpu.memory_space<vmem>>, vector<1x32xf32>
    %c328 = arith.constant 328 : index
    %c0_24 = arith.constant 0 : index
    %51 = vector.load %arg3[%c328, %c0_24] : memref<336x32xf32, #tpu.memory_space<vmem>>, vector<1x1xf32>
    %52 = vector.broadcast %50 : vector<1x32xf32> to vector<8x32xf32>
    %53 = arith.mulf %49, %52 : vector<8x32xf32>
    %cst_25 = arith.constant dense<0.000000e+00> : vector<8xf32>
    %54 = vector.multi_reduction <add>, %53, %cst_25 [1] : vector<8x32xf32> to vector<8xf32>
    %55 = vector.shape_cast %54 : vector<8xf32> to vector<8x1xf32>
    %56 = vector.broadcast %51 : vector<1x1xf32> to vector<8x1xf32>
    %57 = arith.addf %55, %56 : vector<8x1xf32>
    %c0_26 = arith.constant 0 : index
    %c0_27 = arith.constant 0 : index
    %58 = vector.load %arg4[%c0_26, %c0_27] : memref<8x1xf32, #tpu.memory_space<vmem>>, vector<8x1xf32>
    tpu.vector_store %arg4[%c0_26, %c0_27], %57 {strides = array<i32>} : memref<8x1xf32, #tpu.memory_space<vmem>>, vector<8x1xf32>,
    return
  }
}

</mosaic_0001>

<bundles_post_ra>
// kernel: tpu_custom_call.1
= control target key start
LH: loop header
LB: loop body
LE: loop exit
PB: predicated region body
PF: predicated region fallthrough
CT: control target
= control target key end

     0   :  { %v477_v3 = vmov 0.0   ;;  %vm478_vm0 = vmmov 0   ;;  %vm133_vm1 = vcmask 130048   ;;  %vm297_vm2 = vcmask 261120   ;;  %s675_s3 = inlined_call_operand.vmem [shape: f32[336,32], index: 3, kind: input, shape index: {}]   ;;  %s676_s0 = inlined_call_operand.vmem [shape: f32[8,256], index: 0, kind: input, shape index: {}]   ;;  %s677_s1 = inlined_call_operand.vmem [shape: f32[8,16], index: 1, kind: input, shape index: {}]   ;;  %s678_s2 = inlined_call_operand.vmem [shape: f32[2,256], index: 2, kind: input, shape index: {}]   ;;  %s679_s4 = inlined_call_operand.vmem [shape: f32[8,1], index: 4, kind: output, shape index: {}]  }
   0x1   :  { %v130_v0 = vld [vmem:[%s675_s3 + $0xf8] sm:$0xff]  ;;  %v129_v2 = vld [vmem:[%s675_s3 + $0xf0] sm:$0xff]  ;;  %449 = vmatprep.subr.mxu0 %v477_v3  ;;  %453 = vmatprep.mubr.msk.f32.mxu0 %vm478_vm0, %v477_v3  ;;  %v128_v5 = vld [vmem:[%s675_s3 + $0xe8] sm:$0xff]  ;;  %vm391_vm5 = vcmask 7168  }
   0x2   :  { %v114_v1 = vld [vmem:[%s675_s3 + $0x78] sm:$0xff]  ;;  %409 = vmatprep.subr.mxu1 %v130_v0  ;;  %v113_v4 = vld [vmem:[%s675_s3 + $0x70] sm:$0xff]  ;;  %v112_v6 = vld [vmem:[%s675_s3 + $0x68] sm:$0xff] }
   0x3   :  { %410 = vmatpush3.msra.mxu1 %v114_v1  ;;  %v127_v7 = vld [vmem:[%s675_s3 + $0xe0] sm:$0xff]  ;;  %v126_v9 = vld [vmem:[%s675_s3 + $0xd8] sm:$0xff]  ;;  %v125_v11 = vld [vmem:[%s675_s3 + $0xd0] sm:$0xff] }
   0x4   :  { %411 = vmatprep.subr.mxu1 %v129_v2  ;;  %v111_v8 = vld [vmem:[%s675_s3 + $0x60] sm:$0xff]  ;;  %v110_v10 = vld [vmem:[%s675_s3 + $0x58] sm:$0xff]  ;;  %v109_v12 = vld [vmem:[%s675_s3 + $0x50] sm:$0xff] }
   0x5   :  { %412 = vmatpush3.msra.mxu1 %v113_v4  ;;  %v124_v13 = vld [vmem:[%s675_s3 + $0xc8] sm:$0xff]  ;;  %v555_v16 = vld [vmem:[%s676_s0] sm:$0xff]  ;;  %v122_v26 = vld [vmem:[%s675_s3 + $0xb8] sm:$0xff] }
   0x6   :  { %413 = vmatprep.subr.mxu1 %v128_v5  ;;  %v132_v14 = vld [vmem:[%s675_s3 + $0x108] sm:$0xff]  ;;  %v123_v18 = vld [vmem:[%s675_s3 + $0xc0] sm:$0xff]  ;;  %v20_v19 = vrot.slane %v555_v16, 4  ;;  %v34_v21 = vmul.f32 %v555_v16, %v555_v16  ;;  %v106_v31 = vld [vmem:[%s675_s3 + $0x38] sm:$0xff] }
   0x7   :  { %414 = vmatpush3.msra.mxu1 %v112_v6  ;;  %v108_v15 = vld [vmem:[%s675_s3 + $0x48] sm:$0xff]  ;;  %450 = vmatpush3.msra.mxu0 %v132_v14  ;;  %v131_v23 = vld [vmem:[%s675_s3 + $0x100] sm:$0xff]  ;;  %v121_v32 = vld [vmem:[%s675_s3 + $0xb0] sm:$0xff] }
   0x8   :  { %415 = vmatprep.subr.mxu1 %v127_v7  ;;  %v560_v17 = vld [vmem:[%s676_s0 + $0x8] sm:$0xff]  ;;  %451 = vmatprep.subr.mxu0 %v477_v3  ;;  %v107_v24 = vld [vmem:[%s675_s3 + $0x40] sm:$0xff]  ;;  %v21_v27 = vadd.f32 %v20_v19, %v555_v16  ;;  %v36_v29 = vrot.slane %v34_v21, 4  ;;  %v105_v37 = vld [vmem:[%s675_s3 + $0x30] sm:$0xff] }
   0x9   :  { %416 = vmatpush3.msra.mxu1 %v111_v8  ;;  %v26_v20 = vrot.slane %v560_v17, 4  ;;  %v35_v22 = vmul.f32 %v560_v17, %v560_v17  ;;  %v19_v25 = vld [vmem:[%s677_s1] sm:$0xff]  ;;  %452 = vmatpush3.msra.mxu0 %v131_v23  ;;  %v120_v38 = vld [vmem:[%s675_s3 + $0xa8] sm:$0xff]  ;;  %v118_v50 = vld [vmem:[%s675_s3 + $0x98] sm:$0xff] }
   0xa   :  { %417 = vmatprep.subr.mxu1 %v126_v9  ;;  %454 = vmatmul.mubr.msk.f32.vlgmr.msra.gmra.mxu0 %vm133_vm1, %v19_v25  ;;  %v22_v33 = vrot.slane %v21_v27, 2  ;;  %v37_v35 = vadd.f32 %v36_v29, %v34_v21  ;;  %v104_v43 = vld [vmem:[%s675_s3 + $0x28] sm:$0xff]  ;;  %v119_v44 = vld [vmem:[%s675_s3 + $0xa0] sm:$0xff]  ;;  %v102_v55 = vld [vmem:[%s675_s3 + $0x18] sm:$0xff] }
   0xb   :  { %418 = vmatpush3.msra.mxu1 %v110_v10  ;;  %v27_v28 = vadd.f32 %v26_v20, %v560_v17  ;;  %v42_v30 = vrot.slane %v35_v22, 4  ;;  %456 = vmatprep.subr.mxu0 %v477_v3  ;;  %v103_v49 = vld [vmem:[%s675_s3 + $0x20] sm:$0xff]  ;;  %v117_v56 = vld [vmem:[%s675_s3 + $0x90] sm:$0xff]  ;;  %v116_v62 = vld [vmem:[%s675_s3 + $0x88] sm:$0xff] }
   0xc   :  { %419 = vmatprep.subr.mxu1 %v125_v11  ;;  %464 = vmatprep.mubr.msk.f32.mxu0 %vm478_vm0, %v477_v3  ;;  %v23_v39 = vadd.f32 %v22_v33, %v21_v27  ;;  %v38_v41 = vrot.slane %v37_v35, 2  ;;  %v101_v61 = vld [vmem:[%s675_s3 + $0x10] sm:$0xff]  ;;  %v100_v4 = vld [vmem:[%s675_s3 + $0x8] sm:$0xff]  ;;  %v115_v5 = vld [vmem:[%s675_s3 + $0x80] sm:$0xff]  ;;  %v60_v11 = vlaneseq }
   0xd   :  { %420 = vmatpush3.msra.mxu1 %v109_v12  ;;  %v28_v34 = vrot.slane %v27_v28, 2  ;;  %v43_v36 = vadd.f32 %v42_v30, %v35_v22  ;;  %v99_v8 = vld [vmem:[%s675_s3] sm:$0xff] }
   0xe   :  { %421 = vmatprep.subr.mxu1 %v124_v13  ;;  %v24_v45 = vrot.slane %v23_v39, 1  ;;  %v39_v47 = vadd.f32 %v38_v41, %v37_v35  ;;  %v61_v12 = vshrl.u32 %v60_v11, 7  ;;  %v58_v14 = vld [vmem:[%s678_s2] ss:$2 sm:$0x3]  ;;  %v291_v35 = vld [vmem:[%s675_s3 + $0x128] sm:$0xff] }
   0xf   :  { %422 = vmatpush3.msra.mxu1 %v108_v15  ;;  %v29_v40 = vadd.f32 %v28_v34, %v27_v28  ;;  %v44_v42 = vrot.slane %v43_v36, 2  ;;  %v397_v21 = vld [vmem:[%s678_s2 + $0x1] ss:$2 sm:$0x3]  ;;  %457 = vmatpush3.msra.mxu0 %v291_v35 }
  0x10   :  { %423 = vmatprep.subr.mxu1 %v123_v18  ;;  %v25_v51 = vadd.f32 %v24_v45, %v23_v39  ;;  %v40_v53 = vrot.slane %v39_v47, 1  ;;  %v62_v13 = vsub.s32 0, %v61_v12  ;;  %v66_v15 = vsub.s32 1, %v61_v12  ;;  %458 = vmatprep.subr.mxu0 %v477_v3 }
  0x11   :  { %424 = vmatpush3.msra.mxu1 %v107_v24  ;;  %v30_v46 = vrot.slane %v29_v40, 1  ;;  %v45_v48 = vadd.f32 %v44_v42, %v43_v36  ;;  %v288_v36 = vld [vmem:[%s675_s3 + $0x110] sm:$0xff]  ;;  %v399_v42 = vld [vmem:[%s675_s3 + $0x138] ss:$0 sm:$0xff] }
  0x12   :  { %425 = vmatprep.subr.mxu1 %v122_v26  ;;  %v32_v57 = vmul.f32 0.125, %v25_v51  ;;  %v41_v59 = vadd.f32 %v40_v53, %v39_v47  ;;  %v63_v18 = vrot.slane %v58_v14, %v62_v13  ;;  %v67_v19 = vrot.slane %v58_v14, %v66_v15 }
  0x13   :  { %426 = vmatpush3.msra.mxu1 %v106_v31  ;;  %v31_v52 = vadd.f32 %v30_v46, %v29_v40  ;;  %v46_v54 = vrot.slane %v45_v48, 1  ;;  %v90_v27 = vrot.slane %v397_v21, %v62_v13  ;;  %v94_v30 = vrot.slane %v397_v21, %v66_v15 }
  0x14   :  { %427 = vmatprep.subr.mxu1 %v121_v32  ;;  %v48_v63 = vmul.f32 0.125, %v41_v59  ;;  %v50_v1 = vmul.f32 %v32_v57, %v32_v57  ;;  %v72_v24 = vsub.f32 %v555_v16, %v32_v57  ;;  %v290_v16 = vld [vmem:[%s675_s3 + $0x120] sm:$0xff]  ;;  %v405_v59 = vld [vmem:[%s675_s3 + $0x148] ss:$0 sm:$0xff] }
  0x15   :  { %428 = vmatpush3.msra.mxu1 %v105_v37  ;;  %v33_v58 = vmul.f32 0.125, %v31_v52  ;;  %v47_v60 = vadd.f32 %v46_v54, %v45_v48  ;;  %459 = vmatpush3.msra.mxu0 %v290_v16 }
  0x16   :  { %429 = vmatprep.subr.mxu1 %v120_v38  ;;  %v52_v6 = vsub.f32 %v48_v63, %v50_v1  ;;  %460 = vmatprep.subr.mxu0 %v477_v3 }
  0x17   :  { %430 = vmatpush3.msra.mxu1 %v104_v43  ;;  %v49_v0 = vmul.f32 0.125, %v47_v60  ;;  %v51_v2 = vmul.f32 %v33_v58, %v33_v58  ;;  %v73_v26 = vsub.f32 %v560_v17, %v33_v58  ;;  %v289_v17 = vld [vmem:[%s675_s3 + $0x118] sm:$0xff] }
  0x18   :  { %431 = vmatprep.subr.mxu1 %v119_v44  ;;  %v54_v9 = vadd.f32 1e-05, %v52_v6  ;;  %461 = vmatpush3.msra.mxu0 %v289_v17 }
  0x19   :  { %432 = vmatpush3.msra.mxu1 %v103_v49  ;;  %v53_v7 = vsub.f32 %v49_v0, %v51_v2  ;;  %462 = vmatprep.subr.mxu0 %v477_v3  ;;  %v401_v3 = vld [vmem:[%s675_s3 + $0x140] ss:$0 sm:$0xff] }
  0x1a   :  { %433 = vmatprep.subr.mxu1 %v118_v50  ;;  %469 = vrsqrt.f32 %v54_v9  ;;  %463 = vmatpush3.msra.mxu0 %v288_v36 }
  0x1b   :  { %434 = vmatpush3.msra.mxu1 %v102_v55  ;;  %v55_v10 = vadd.f32 1e-05, %v53_v7  ;;  %v404_v55 = vld [vmem:[%s675_s3 + $0x130] ss:$0 sm:$0xff] }
  0x1c   :  { %435 = vmatprep.subr.mxu1 %v117_v56 }
  0x1d   :  { %436 = vmatpush3.msra.mxu1 %v101_v61  ;;  %471 = vrsqrt.f32 %v55_v10 }
  0x1e   :  { %437 = vmatprep.subr.mxu1 %v116_v62 }
  0x1f   :  { %438 = vmatpush3.msra.mxu1 %v100_v4 }
  0x20   :  { %439 = vmatprep.subr.mxu1 %v115_v5 }
  0x21   :  { %440 = vmatpush3.msra.mxu1 %v99_v8 }
  0x27   :  { %v470_v20 = vpop.eup %469 }
  0x28   :  { %v70_v23 = vmul.f32 %v470_v20, %v63_v18 }
  0x2a   :  { %v472_v22 = vpop.eup %471  ;;  %v77_v28 = vrot.slane %v70_v23, %v62_v13 }
  0x2b   :  { %v71_v25 = vmul.f32 %v472_v22, %v67_v19 }
  0x2c   :  { %v82_v31 = vmul.f32 %v77_v28, %v72_v24 }
  0x2d   :  { %v81_v29 = vrot.slane %v71_v25, %v62_v13 }
  0x2e   :  { %v97_v33 = vadd.f32 %v90_v27, %v82_v31 }
  0x2f   :  { %v83_v32 = vmul.f32 %v81_v29, %v73_v26 }
  0x31   :  { %v98_v34 = vadd.f32 %v94_v30, %v83_v32 }
  0x33   :  { %271 = vmatprep.mubr.f32.mxu1 %v98_v34 }
  0x34   :  { %272 = vmatmul.mubr.f32.vlgmr.msra.gmra.mxu1 %v97_v33 }
  0xca   :  { %v203_v37 = vpop.f32.mrf.mxu0 }
  0xcc   :  { %v455_v38 = vpop.f32.mrf.mxu0 }
  0xf4   :  { %v441_v39 = vpop.f32.mrf.mxu1 }
  0xf6   :  { %v442_v40 = vpop.f32.mrf.mxu1 }
  0xf7   :  { %v443_v41 = vadd.f32 %v442_v40, %v441_v39 }
  0xf9   :  { %v274_v43 = vadd.f32 %v443_v41, %v203_v37 }
  0xfb   :  { %v282_v44 = vadd.f32 %v399_v42, %v274_v43 }
  0xfd   :  { %v284_v45 = vmul.f32 1.442695, %v282_v44  ;;  %vm283_vm3 = vcmp.gt.f32.partialorder %v282_v44, 0.0 }
  0xff   :  { %473 = vpow2.f32 %v284_v45 }
 0x10c   :  { %v474_v46 = vpop.eup %473 }
 0x10d   :  { %v400_v47 = vadd.f32 -1.0, %v474_v46 }
 0x10f   :  { %v287_v48 = vsel %vm283_vm3, %v282_v44, %v400_v47 }
 0x110   :  { %465 = vmatmul.mubr.msk.f32.vlgmr.msra.gmra.mxu0 %vm297_vm2, %v287_v48 }
 0x1d0   :  { %v367_v49 = vpop.f32.mrf.mxu0 }
 0x1d1   :  { %v368_v50 = vadd.f32 %v401_v3, %v367_v49 }
 0x1d2   :  { %v466_v51 = vpop.f32.mrf.mxu0 }
 0x1d3   :  { %v372_v52 = vmul.f32 1.442695, %v368_v50  ;;  %vm371_vm4 = vcmp.gt.f32.partialorder %v368_v50, 0.0 }
 0x1d5   :  { %475 = vpow2.f32 %v372_v52 }
 0x1e2   :  { %v476_v53 = vpop.eup %475 }
 0x1e3   :  { %v403_v54 = vadd.f32 -1.0, %v476_v53 }
 0x1e5   :  { %v375_v56 = vsel %vm371_vm4, %v368_v50, %v403_v54 }
 0x1e6   :  { %v382_v57 = vmul.f32 %v404_v55, %v375_v56 }
 0x1e8   :  { %v383_v58 = vsel %vm297_vm2, %v382_v57, 0.0 }
 0x1e9   :  { %384 = vadd.xlane.f32.xlu0 %v383_v58 }
 0x272   :  { %v385_v60 = vpop.xlane.xlu0 %384 }
 0x273   :  { %v390_v61 = vadd.f32 %v405_v59, %v385_v60 }
 0x275   :  { %392 = vst.msk [vmem:[%s679_s4] sm:$0xff] %vm391_vm5, %v390_v61 }

</bundles_post_ra>
